<compile_context>
chip_gen: v7x
topology: tpu7x:2x2x1
jax: 0.10.0
libtpu: 0.0.40
codegen_flags: <defaults>
</compile_context>

<pallas_src>
import functools

import jax
import jax.numpy as jnp
from jax import lax
from jax.experimental import pallas as pl
from jax.experimental.pallas import tpu as pltpu


# ----------------------------------------------------------------------------
# Pallas kernel: whole forward pass (matmuls + ReLU + fused heads + exp).
# ----------------------------------------------------------------------------
def _deep_ensemble_kernel(n_layers, *refs):
    # refs layout:
    #   refs[0]                 : x tile              (F, TB)   bf16
    #   refs[1 : 1+2*n_layers]  : (w_i, b_i) pairs    w_i:(H,in) bf16, b_i:(H,1) f32
    #   next 2                  : w_heads (2,H) bf16, b_heads (2,1) f32
    #   last 1                  : out tile            (2, TB)   f32  (row0=mu, row1=var)
    x_ref = refs[0]
    idx = 1

    # batch-on-lanes activations; bf16 feeds the MXU, bias-add/ReLU stay in f32
    h = x_ref[...]                                            # (F, TB) bf16
    for _ in range(n_layers):
        w = refs[idx][...]                                    # (H, in) bf16
        b = refs[idx + 1][...]                                # (H, 1)  f32
        idx += 2
        z = jnp.dot(w, h, preferred_element_type=jnp.float32) + b   # (H, TB) f32
        h = jnp.maximum(z, 0.0).astype(jnp.bfloat16)          # ReLU, back to bf16

    w_heads = refs[idx][...]                                  # (2, H) bf16
    b_heads = refs[idx + 1][...]                              # (2, 1) f32
    out_ref = refs[idx + 2]

    # single fused head matmul: row 0 = mu logits, row 1 = var logits
    z = jnp.dot(w_heads, h, preferred_element_type=jnp.float32) + b_heads  # (2, TB)
    # exp on the var row only, via a full-vreg select (no sublane slice/concat:
    # the extra exp rides the otherwise-idle EUP slot, select stays on the VPU)
    row = lax.broadcasted_iota(jnp.int32, z.shape, 0)
    out_ref[...] = jnp.where(row == 1, jnp.exp(z), z)


# ----------------------------------------------------------------------------
# Wrapper: lane-dense tiling, resident weights, parallel batch grid.
# ----------------------------------------------------------------------------
def _round_up(x, m):
    return ((x + m - 1) // m) * m


def _tensorcores_per_chip():
    # v7x has 2 TensorCores per chip; v5e/v6e have 1 (grid = serial loop there).
    try:
        kind = jax.devices()[0].device_kind.lower()
    except Exception:
        return 1
    if "v7" in kind or "7x" in kind:
        return 2
    return 1


def deep_ensemble_forward(x, params, *, block_batch=8192):
    B, F = x.shape
    n_layers = len(params["layers"])

    # ---- batch tile selection --------------------------------------------
    # Pad B up to a lane multiple; never shrink the tile for awkward batch sizes.
    cap = max(128, (block_batch // 128) * 128)       # per-step cap, 128-aligned
    n_tc = _tensorcores_per_chip()
    b_pad = _round_up(B, 128)
    if n_tc >= 2 and b_pad >= 256:
        # two balanced fat tiles -> both v7x TensorCores get equal work
        bb = min(_round_up(-(-b_pad // 2), 128), cap)
    else:
        # single-TC chip: take the whole (padded) batch in one step if it fits the cap
        bb = min(b_pad, cap)
    b_pad = _round_up(b_pad, bb)
    grid = (b_pad // bb,)

    # batch-on-lanes + bf16 at the transpose: halves the x DMA bytes per tile
    x_t = x.T.astype(jnp.bfloat16)                   # (F, B)
    if b_pad != B:
        x_t = jnp.pad(x_t, ((0, 0), (0, b_pad - B)))  # zero columns, sliced off below

    args = [x_t]
    in_specs = [pl.BlockSpec((F, bb), lambda i: (0, i))]

    def _rep_spec(shape):
        # full-array block, same block every grid step -> weights stay resident
        return pl.BlockSpec(shape, lambda i: (0, 0))

    for (w, b) in params["layers"]:
        args += [w.astype(jnp.bfloat16), b]          # w:(H,in) bf16, b:(H,1) f32
        in_specs += [_rep_spec(w.shape), _rep_spec(b.shape)]

    # fuse mu/var heads: (2, H) weight, (2, 1) bias
    w_mu, b_mu = params["mu"]
    w_var, b_var = params["var"]
    w_heads = jnp.concatenate([w_mu, w_var], axis=0).astype(jnp.bfloat16)  # (2, H)
    b_heads = jnp.concatenate([b_mu, b_var], axis=0)                       # (2, 1)
    args += [w_heads, b_heads]
    in_specs += [_rep_spec(w_heads.shape), _rep_spec(b_heads.shape)]

    # single lane-dense output slab: (2, B_pad) with batch on lanes
    out_specs = pl.BlockSpec((2, bb), lambda i: (0, i))
    out_shape = jax.ShapeDtypeStruct((2, b_pad), jnp.float32)

    kernel = functools.partial(_deep_ensemble_kernel, n_layers)
    out = pl.pallas_call(
        kernel,
        grid=grid,
        in_specs=in_specs,
        out_specs=out_specs,
        out_shape=out_shape,
        compiler_params=pltpu.CompilerParams(
            dimension_semantics=("parallel",),
            # documented cap, not a tuning knob: at F=H=32 even bb=8192 uses
            # ~2-3 MiB of VMEM, far under every generation's budget (incl. v7x 64 MiB)
            vmem_limit_bytes=32 * 1024 * 1024,
        ),
    )(*args)

    mu = out[0, :B].reshape(B, 1)
    var = out[1, :B].reshape(B, 1)
    return mu, var


# ----------------------------------------------------------------------------
# PyTorch-style init (nn.Linear default U(-k, k), k = 1/sqrt(fan_in)).
# Weights kept in PyTorch's native (out, in) layout; biases as (out, 1).
# ----------------------------------------------------------------------------
def init_params(key, num_features, hidden_size, n_layers):
    params = {"layers": []}
    in_size = num_features
    for _ in range(n_layers):
        key, kw, kb = jax.random.split(key, 3)
        k = 1.0 / jnp.sqrt(in_size)
        w = jax.random.uniform(kw, (hidden_size, in_size), jnp.float32, -k, k)
        b = jax.random.uniform(kb, (hidden_size, 1), jnp.float32, -k, k)
        params["layers"].append((w, b))
        in_size = hidden_size
    for name in ("mu", "var"):
        key, kw, kb = jax.random.split(key, 3)
        k = 1.0 / jnp.sqrt(hidden_size)
        w = jax.random.uniform(kw, (1, hidden_size), jnp.float32, -k, k)
        b = jax.random.uniform(kb, (1, 1), jnp.float32, -k, k)
        params[name] = (w, b)
    return params


# Pure-JAX reference that mirrors the kernel's bf16-matmul / f32-accumulate math.
def reference_forward(x, params):
    h = x.astype(jnp.bfloat16)
    for (w, b) in params["layers"]:
        z = jnp.dot(h, w.T.astype(jnp.bfloat16),
                    preferred_element_type=jnp.float32) + b[:, 0]
        h = jnp.maximum(z, 0.0).astype(jnp.bfloat16)
    w_mu, b_mu = params["mu"]
    w_var, b_var = params["var"]
    mu = jnp.dot(h, w_mu.T.astype(jnp.bfloat16),
                 preferred_element_type=jnp.float32) + b_mu[:, 0]
    var = jnp.exp(jnp.dot(h, w_var.T.astype(jnp.bfloat16),
                          preferred_element_type=jnp.float32) + b_var[:, 0])
    return mu, var


if __name__ == "__main__":
    key = jax.random.PRNGKey(0)
    # non-multiple-of-128 batch on purpose: exercises the pad-and-slice path
    batch, num_features, hidden_size, n_layers = 300, 32, 32, 2

    key, kx, kp = jax.random.split(key, 3)
    x = jax.random.normal(kx, (batch, num_features), jnp.float32)
    params = init_params(kp, num_features, hidden_size, n_layers)

    mu, var = deep_ensemble_forward(x, params)
    jax.block_until_ready((mu, var))

    mu_ref, var_ref = reference_forward(x, params)
    assert mu.shape == (batch, 1) and var.shape == (batch, 1)
    assert bool(jnp.all(var > 0.0))
    # small tolerance: only accumulation-order differences (MXU vs XLA) remain
    assert jnp.allclose(mu, mu_ref, atol=2e-3, rtol=2e-3)
    assert jnp.allclose(var, var_ref, atol=2e-3, rtol=2e-3)

    print("KERNEL_OK")
</pallas_src>

<mosaic_0001>
module attributes {stable_mosaic.version = 11 : i64} {
  func.func @_deep_ensemble_kernel(%arg0: i32, %arg1: memref<32x384xbf16, #tpu.memory_space<vmem>>, %arg2: memref<32x32xbf16, #tpu.memory_space<vmem>>, %arg3: memref<32x1xf32, #tpu.memory_space<vmem>>, %arg4: memref<32x32xbf16, #tpu.memory_space<vmem>>, %arg5: memref<32x1xf32, #tpu.memory_space<vmem>>, %arg6: memref<2x32xbf16, #tpu.memory_space<vmem>>, %arg7: memref<2x1xf32, #tpu.memory_space<vmem>>, %arg8: memref<2x384xf32, #tpu.memory_space<vmem>>) attributes {dimension_semantics = [#tpu.dimension_semantics<parallel>], iteration_bounds = array<i64: 1>, scalar_prefetch = 0 : i64, scratch_operands = 0 : i64, tpu.core_type = #tpu.core_type<tc>, window_params = [{transform_indices = @transform_0, window_bounds = array<i64: 32, 384>}, {pipeline_mode = #tpu.pipeline_mode<synchronous>, transform_indices = @transform_1, window_bounds = array<i64: 32, 32>}, {pipeline_mode = #tpu.pipeline_mode<synchronous>, transform_indices = @transform_2, window_bounds = array<i64: 32, 1>}, {pipeline_mode = #tpu.pipeline_mode<synchronous>, transform_indices = @transform_3, window_bounds = array<i64: 32, 32>}, {pipeline_mode = #tpu.pipeline_mode<synchronous>, transform_indices = @transform_4, window_bounds = array<i64: 32, 1>}, {pipeline_mode = #tpu.pipeline_mode<synchronous>, transform_indices = @transform_5, window_bounds = array<i64: 2, 32>}, {pipeline_mode = #tpu.pipeline_mode<synchronous>, transform_indices = @transform_6, window_bounds = array<i64: 2, 1>}, {transform_indices = @transform_7, window_bounds = array<i64: 2, 384>}]} {
    %c0 = arith.constant 0 : index
    %c0_0 = arith.constant 0 : index
    %0 = vector.load %arg1[%c0, %c0_0] : memref<32x384xbf16, #tpu.memory_space<vmem>>, vector<32x384xbf16>
    %c0_1 = arith.constant 0 : index
    %c0_2 = arith.constant 0 : index
    %1 = vector.load %arg2[%c0_1, %c0_2] : memref<32x32xbf16, #tpu.memory_space<vmem>>, vector<32x32xbf16>
    %c0_3 = arith.constant 0 : index
    %c0_4 = arith.constant 0 : index
    %2 = vector.load %arg3[%c0_3, %c0_4] : memref<32x1xf32, #tpu.memory_space<vmem>>, vector<32x1xf32>
    %cst = arith.constant dense<0.000000e+00> : vector<32x384xf32>
    %3 = tpu.matmul %1, %0, %cst {dimension_numbers = #tpu.dot_dimension_numbers<[1], [0], [0], [1], [0, 0, 1, 1], [], []>} : vector<32x32xbf16>, vector<32x384xbf16>, vector<32x384xf32> -> vector<32x384xf32>
    %4 = vector.broadcast %2 : vector<32x1xf32> to vector<32x384xf32>
    %5 = arith.addf %3, %4 : vector<32x384xf32>
    %cst_5 = arith.constant 0.000000e+00 : f32
    %6 = vector.broadcast %cst_5 : f32 to vector<32x384xf32>
    %7 = arith.maximumf %5, %6 : vector<32x384xf32>
    %8 = arith.truncf %7 : vector<32x384xf32> to vector<32x384xbf16>
    %c0_6 = arith.constant 0 : index
    %c0_7 = arith.constant 0 : index
    %9 = vector.load %arg4[%c0_6, %c0_7] : memref<32x32xbf16, #tpu.memory_space<vmem>>, vector<32x32xbf16>
    %c0_8 = arith.constant 0 : index
    %c0_9 = arith.constant 0 : index
    %10 = vector.load %arg5[%c0_8, %c0_9] : memref<32x1xf32, #tpu.memory_space<vmem>>, vector<32x1xf32>
    %cst_10 = arith.constant dense<0.000000e+00> : vector<32x384xf32>
    %11 = tpu.matmul %9, %8, %cst_10 {dimension_numbers = #tpu.dot_dimension_numbers<[1], [0], [0], [1], [0, 0, 1, 1], [], []>} : vector<32x32xbf16>, vector<32x384xbf16>, vector<32x384xf32> -> vector<32x384xf32>
    %12 = vector.broadcast %10 : vector<32x1xf32> to vector<32x384xf32>
    %13 = arith.addf %11, %12 : vector<32x384xf32>
    %cst_11 = arith.constant 0.000000e+00 : f32
    %14 = vector.broadcast %cst_11 : f32 to vector<32x384xf32>
    %15 = arith.maximumf %13, %14 : vector<32x384xf32>
    %16 = arith.truncf %15 : vector<32x384xf32> to vector<32x384xbf16>
    %c0_12 = arith.constant 0 : index
    %c0_13 = arith.constant 0 : index
    %17 = vector.load %arg6[%c0_12, %c0_13] : memref<2x32xbf16, #tpu.memory_space<vmem>>, vector<2x32xbf16>
    %c0_14 = arith.constant 0 : index
    %c0_15 = arith.constant 0 : index
    %18 = vector.load %arg7[%c0_14, %c0_15] : memref<2x1xf32, #tpu.memory_space<vmem>>, vector<2x1xf32>
    %cst_16 = arith.constant dense<0.000000e+00> : vector<2x384xf32>
    %19 = tpu.matmul %17, %16, %cst_16 {dimension_numbers = #tpu.dot_dimension_numbers<[1], [0], [0], [1], [0, 0, 1, 1], [], []>} : vector<2x32xbf16>, vector<32x384xbf16>, vector<2x384xf32> -> vector<2x384xf32>
    %20 = vector.broadcast %18 : vector<2x1xf32> to vector<2x384xf32>
    %21 = arith.addf %19, %20 : vector<2x384xf32>
    %22 = tpu.iota {dimensions = array<i32: 0>} : vector<2x384xi32>
    %c1_i32 = arith.constant 1 : i32
    %23 = vector.broadcast %c1_i32 : i32 to vector<2x384xi32>
    %24 = arith.cmpi eq, %22, %23 : vector<2x384xi32>
    %25 = math.exp %21 : vector<2x384xf32>
    %26 = arith.select %24, %25, %21 : vector<2x384xi1>, vector<2x384xf32>
    %c0_17 = arith.constant 0 : index
    %c0_18 = arith.constant 0 : index
    %27 = vector.load %arg8[%c0_17, %c0_18] : memref<2x384xf32, #tpu.memory_space<vmem>>, vector<2x384xf32>
    tpu.vector_store %arg8[%c0_17, %c0_18], %26 {strides = array<i32>} : memref<2x384xf32, #tpu.memory_space<vmem>>, vector<2x384xf32>,
    return
  }
  func.func @transform_0(%arg0: i32) -> (i32, i32) {
    %c0_i32 = arith.constant 0 : i32
    %c0_i32_0 = arith.constant 0 : i32
    return %c0_i32, %arg0 : i32, i32
  }
  func.func @transform_1(%arg0: i32) -> (i32, i32) {
    %c0_i32 = arith.constant 0 : i32
    %c0_i32_0 = arith.constant 0 : i32
    %c0_i32_1 = arith.constant 0 : i32
    return %c0_i32, %c0_i32_0 : i32, i32
  }
  func.func @transform_2(%arg0: i32) -> (i32, i32) {
    %c0_i32 = arith.constant 0 : i32
    %c0_i32_0 = arith.constant 0 : i32
    %c0_i32_1 = arith.constant 0 : i32
    return %c0_i32, %c0_i32_0 : i32, i32
  }
  func.func @transform_3(%arg0: i32) -> (i32, i32) {
    %c0_i32 = arith.constant 0 : i32
    %c0_i32_0 = arith.constant 0 : i32
    %c0_i32_1 = arith.constant 0 : i32
    return %c0_i32, %c0_i32_0 : i32, i32
  }
  func.func @transform_4(%arg0: i32) -> (i32, i32) {
    %c0_i32 = arith.constant 0 : i32
    %c0_i32_0 = arith.constant 0 : i32
    %c0_i32_1 = arith.constant 0 : i32
    return %c0_i32, %c0_i32_0 : i32, i32
  }
  func.func @transform_5(%arg0: i32) -> (i32, i32) {
    %c0_i32 = arith.constant 0 : i32
    %c0_i32_0 = arith.constant 0 : i32
    %c0_i32_1 = arith.constant 0 : i32
    return %c0_i32, %c0_i32_0 : i32, i32
  }
  func.func @transform_6(%arg0: i32) -> (i32, i32) {
    %c0_i32 = arith.constant 0 : i32
    %c0_i32_0 = arith.constant 0 : i32
    %c0_i32_1 = arith.constant 0 : i32
    return %c0_i32, %c0_i32_0 : i32, i32
  }
  func.func @transform_7(%arg0: i32) -> (i32, i32) {
    %c0_i32 = arith.constant 0 : i32
    %c0_i32_0 = arith.constant 0 : i32
    return %c0_i32, %arg0 : i32, i32
  }
}

</mosaic_0001>

<bundles_post_ra>
// kernel: tpu_custom_call.1
= control target key start
LH: loop header
LB: loop body
LE: loop exit
PB: predicated region body
PF: predicated region fallthrough
CT: control target
= control target key end

     0   :  { %v639_v2 = vmov 0   ;;  %vm106_vm0 = vcmask 261120   ;;  %s773_s0 = inlined_call_operand.vmem [shape: bf16[32,384], index: 0, kind: input, shape index: {}]   ;;  %s774_s1 = inlined_call_operand.vmem [shape: bf16[32,32], index: 1, kind: input, shape index: {}]   ;;  %s775_s2 = inlined_call_operand.vmem [shape: f32[32,1], index: 2, kind: input, shape index: {}]   ;;  %s776_s3 = inlined_call_operand.vmem [shape: bf16[32,32], index: 3, kind: input, shape index: {}]   ;;  %s777_s4 = inlined_call_operand.vmem [shape: f32[32,1], index: 4, kind: input, shape index: {}]   ;;  %s778_s5 = inlined_call_operand.vmem [shape: bf16[2,32], index: 5, kind: input, shape index: {}]   ;;  %s779_s6 = inlined_call_operand.vmem [shape: f32[2,1], index: 6, kind: input, shape index: {}]   ;;  %s780_s7 = inlined_call_operand.hbm [shape: f32[2,384], index: 7, kind: output, shape index: {}]  }
   0x1   :  { %v597_v0 = vld [vmem:[%s773_s0 + $0x4] ss:$12 sps:$4 sm:$0xff]   ;;  %v599_v1 = vld [vmem:[%s773_s0 + $0x8] ss:$12 sps:$4 sm:$0xff]   ;;  %145 = vmatprep.mubr.bf16.mxu0 %v639_v2  ;;  %595 = vset.pattern.permute.xlu0 %v639_v2  ;;  %v600_v3 = vld [vmem:[%s773_s0] ss:$12 sps:$4 sm:$0xff]  }
   0x2   :  { %113 = vmatprep.subr.bf16.mxu0 %v597_v0  ;;  %596 = vset.pattern.permute.xlu1 %v639_v2  ;;  %v601_v4 = vld [vmem:[%s773_s0 + $0x1c] ss:$12 sps:$4 sm:$0xff]   ;;  %v603_v5 = vld [vmem:[%s773_s0 + $0x20] ss:$12 sps:$4 sm:$0xff]   ;;  %v604_v6 = vld [vmem:[%s773_s0 + $0x18] ss:$12 sps:$4 sm:$0xff]  }
   0x3   :  { %566 = vmatprep.subr.bf16.mxu1 %v599_v1  ;;  %114 = vmatpush1.bf16.msra.mxu0 %v600_v3  ;;  %v605_v7 = vld [vmem:[%s774_s1] sm:$0xff]   ;;  %v606_v9 = vld [vmem:[%s774_s1 + $0x8] sm:$0xff]   ;;  %v42_v10 = vld [vmem:[%s775_s2 + $0x10] sm:$0xff] }
   0x4   :  { %567 = vmatpush3.bf16.msra.mxu1 %v599_v1  ;;  %115 = vmatprep.subr.bf16.mxu0 %v601_v4  ;;  %v40_v8 = vld [vmem:[%s775_s2] sm:$0xff]  ;;  %v41_v11 = vld [vmem:[%s775_s2 + $0x8] sm:$0xff]  ;;  %v43_v12 = vld [vmem:[%s775_s2 + $0x18] sm:$0xff] }
   0x5   :  { %568 = vmatprep.subr.bf16.mxu1 %v603_v5  ;;  %570 = vmatprep.mubr.msk.bf16.mxu1 %vm106_vm0, %v605_v7 }
   0x6   :  { %46 = vperm.xlu0 %595, %v40_v8   ;;  %56 = vperm.xlu1 %596, %v42_v10  }
   0x7   :  { %116 = vmatpush1.bf16.msra.mxu0 %v604_v6 }
   0x8   :  { %569 = vmatpush3.bf16.msra.mxu1 %v603_v5 }
   0xa   :  { %543 = vmatmul.mubr.msk.bf16.vlgmr.msra.gmra.mrb[0].mxu0 %vm106_vm0, %v605_v7 }
   0xb   :  { %571 = vmatmul.mubr.msk.bf16.vlgmr.msra.gmra.mrb[0].mxu1 %vm106_vm0, %v606_v9 }
   0xc   :  { %12 = vsyncpa [#allocation3], 0  ;;  %155 = vmatprep.mubr.bf16.mxu0 %v639_v2  ;;  %51 = vperm.xlu0 %595, %v41_v11   ;;  %v237_v13 = vld [vmem:[%s777_s4] sm:$0xff]  ;;  %v238_v14 = vld [vmem:[%s777_s4 + $0x8] sm:$0xff]  ;;  %v640_v3 = vmov 0.0   ;;  %vm641_vm1 = vmmov 0  }
   0xd   :  { %61 = vperm.xlu1 %596, %v43_v12   ;;  %309 = vmatprep.mubr.bf16.mxu1 %v639_v2  ;;  %v239_v15 = vld [vmem:[%s777_s4 + $0x10] sm:$0xff]  ;;  %v240_v16 = vld [vmem:[%s777_s4 + $0x18] sm:$0xff]  ;;  %v398_v17 = vld [vmem:[%s779_s6] sm:$0x3] }
   0xe   :  { %v607_v18 = vld [vmem:[%s776_s3] sm:$0xff]   ;;  %v608_v63 = vld [vmem:[%s776_s3 + $0x8] sm:$0xff]  }
  0x10   :  { %243 = vperm.xlu0 %595, %v237_v13  }
  0x11   :  { %248 = vperm.xlu1 %596, %v238_v14  }
  0x12   :  { %544 = vmatmul.mubr.msk.bf16.gmra.mrb[4].mxu0 %vm106_vm0, %v606_v9 }
  0x13   :  { %578 = vmatprep.mubr.msk.bf16.mxu0 %vm106_vm0, %v607_v18 }
  0x14   :  { %253 = vperm.xlu0 %595, %v239_v15  }
  0x15   :  { %258 = vperm.xlu1 %596, %v240_v16  }
  0x18   :  { %401 = vperm.xlu0 %595, %v398_v17  }
  0x85   :  { %v47_v19 = vpop.permute.xlu0 %46  ;;  %v57_v20 = vpop.permute.xlu1 %56 }
  0x8b   :  { %v52_v21 = vpop.permute.xlu0 %51 }
  0x8c   :  { %v62_v22 = vpop.permute.xlu1 %61 }
  0x8f   :  { %v244_v4 = vpop.permute.xlu0 %243 }
  0x90   :  { %v249_v5 = vpop.permute.xlu1 %248 }
  0x93   :  { %v254_v6 = vpop.permute.xlu0 %253 }
  0x94   :  { %v259_v10 = vpop.permute.xlu1 %258 }
  0xdd   :  { %v147_v23 = vpop.f32.mrb[0].mxu0 }
  0xde   :  { %v572_v24 = vpop.f32.mrb[0].mxu1  ;;  %v148_v25 = vadd.f32 %v147_v23, %v47_v19  ;;  %v149_v27 = vpop.f32.mrb[1].mxu0 }
  0xdf   :  { %v209_v26 = vadd.f32 %v572_v24, %v57_v20  ;;  %v200_v28 = vpop.f32.mrb[1].mxu1  ;;  %v150_v29 = vadd.f32 %v149_v27, %v47_v19  ;;  %v151_v31 = vpop.f32.mrb[2].mxu0 }
  0xe0   :  { %v201_v30 = vadd.f32 %v200_v28, %v47_v19  ;;  %v573_v32 = vpop.f32.mrb[2].mxu1  ;;  %v152_v34 = vadd.f32 %v151_v31, %v52_v21  ;;  %v153_v36 = vpop.f32.mrb[3].mxu0  ;;  %v215_v41 = vmax.f32 %v148_v25, 0.0 }
  0xe1   :  { %v223_v33 = vmax.f32 %v209_v26, 0.0  ;;  %v212_v35 = vadd.f32 %v573_v32, %v62_v22  ;;  %v203_v37 = vpop.f32.mrb[3].mxu1  ;;  %v154_v39 = vadd.f32 %v153_v36, %v52_v21  ;;  %v216_v44 = vmax.f32 %v150_v29, 0.0 }
  0xe2   :  { %v217_v38 = vmax.f32 %v201_v30, 0.0  ;;  %v204_v40 = vadd.f32 %v203_v37, %v52_v21  ;;  %v218_v42 = vmax.f32 %v152_v34, 0.0 }
  0xe3   :  { %v226_v43 = vmax.f32 %v212_v35, 0.0  ;;  %v219_v45 = vmax.f32 %v154_v39, 0.0 }
  0xe4   :  { %v220_v46 = vmax.f32 %v204_v40, 0.0  ;;  %v227_v47 = vpack.c.bf16 %v218_v42, %v215_v41  ;;  %v397_v40 = vld [vmem:[%s778_s5] sm:$0x1]  ;;  %s643_s5 = smov [#allocation2]  }
  0xe5   :  { %v232_v48 = vpack.c.bf16 %v226_v43, %v223_v33  ;;  %v228_v49 = vpack.c.bf16 %v219_v45, %v216_v44  ;;  %v157_v51 = vpop.f32.mrb[4].mxu0  ;;  %s527_s12 = sshll.u32 %s643_s5, 4  ;;  %s528_s12 = int_to_ptr.vmem [resolvable:$true] %s527_s12 }
  0xe6   :  { %v229_v50 = vpack.c.bf16 %v220_v46, %v217_v38  ;;  %v158_v52 = vadd.f32 %v157_v51, %v57_v20  ;;  %v159_v53 = vpop.f32.mrb[5].mxu0  ;;  %s615_s13 = scalar_lea.vmem %s528_s12, 96  ;;  %p620_p1 = scmp.lt.s32.totalorder %s528_s12, %s528_s12 }
  0xe7   :  { %v160_v54 = vadd.f32 %v159_v53, %v57_v20  ;;  %v161_v55 = vpop.f32.mrb[6].mxu0  ;;  %277 = vmatprep.subr.bf16.mxu1 %v228_v49  ;;  %p616_p0 = scmp.ne.s32.totalorder %s528_s12, %s615_s13  ;;  %p621_p2 = scmp.lt.s32.totalorder %s615_s13, %s615_s13 }
  0xe8   :  { %574 = vmatprep.subr.bf16.mxu0 %v229_v50  ;;  %v162_v56 = vadd.f32 %v161_v55, %v62_v22  ;;  %v163_v57 = vpop.f32.mrb[7].mxu0  ;;  %278 = vmatpush1.bf16.msra.mxu1 %v227_v47  ;;  %v221_v59 = vmax.f32 %v158_v52, 0.0 }
  0xe9   :  { %575 = vmatpush3.bf16.msra.mxu0 %v229_v50  ;;  %v164_v58 = vadd.f32 %v163_v57, %v62_v22  ;;  %v222_v61 = vmax.f32 %v160_v54, 0.0  ;;  %v402_v54 = vpop.permute.xlu0 %401  ;;  %p622_p3 = por %p621_p2, %p620_p1 }
  0xea   :  { %576 = vmatprep.subr.bf16.mxu0 %v232_v48  ;;  %v224_v60 = vmax.f32 %v162_v56, 0.0 }
  0xeb   :  { %v225_v62 = vmax.f32 %v164_v58, 0.0  ;;  %p623_p4 = pnand %p622_p3, %p616_p0 }
  0xec   :  { %v230_v0 = vpack.c.bf16 %v224_v60, %v221_v59 }
  0xed   :  { %577 = vmatpush3.bf16.msra.mxu0 %v232_v48  ;;  %v231_v1 = vpack.c.bf16 %v225_v62, %v222_v61 }
  0xef   :  { %279 = vmatprep.subr.bf16.mxu1 %v231_v1  ;;  %v488_v1 = vlaneseq }
  0xf0   :  { %579 = vmatmul.mubr.msk.bf16.vlgmr.msra.gmra.mrb[8].mxu0 %vm106_vm0, %v608_v63  ;;  %280 = vmatpush1.bf16.msra.mxu1 %v230_v0 }
  0xf1   :  { %439 = vmatprep.mubr.bf16.mxu0 %v639_v2  ;;  %582 = vmatprep.subr.bf16.mxu1 %v640_v3 }
  0xf3   :  { %549 = vmatmul.mubr.msk.bf16.vlgmr.msra.gmra.mrb[4].mxu1 %vm106_vm0, %v607_v18 }
  0xf4   :  { %319 = vmatprep.mubr.bf16.mxu1 %v639_v2 }
  0xfb   :  { %550 = vmatmul.mubr.msk.bf16.gmra.mrb[8].mxu1 %vm106_vm0, %v608_v63 }
  0xfc   :  { %586 = vmatprep.mubr.msk.bf16.mxu1 %vm641_vm1, %v640_v3 }
 0x1c3   :  { %v580_v7 = vpop.f32.mrb[8].mxu0 }
 0x1c4   :  { %v373_v8 = vadd.f32 %v580_v7, %v254_v6  ;;  %v364_v9 = vpop.f32.mrb[9].mxu0 }
 0x1c5   :  { %v365_v11 = vadd.f32 %v364_v9, %v244_v4  ;;  %v581_v12 = vpop.f32.mrb[10].mxu0 }
 0x1c6   :  { %v376_v13 = vadd.f32 %v581_v12, %v259_v10  ;;  %v367_v14 = vpop.f32.mrb[11].mxu0  ;;  %v311_v16 = vpop.f32.mrb[4].mxu1  ;;  %v387_v2 = vmax.f32 %v373_v8, 0.0 }
 0x1c7   :  { %v368_v15 = vadd.f32 %v367_v14, %v249_v5  ;;  %v312_v18 = vadd.f32 %v311_v16, %v244_v4  ;;  %v313_v19 = vpop.f32.mrb[5].mxu1  ;;  %v381_v20 = vmax.f32 %v365_v11, 0.0 }
 0x1c8   :  { %v390_v17 = vmax.f32 %v376_v13, 0.0  ;;  %v314_v22 = vadd.f32 %v313_v19, %v244_v4  ;;  %v315_v23 = vpop.f32.mrb[6].mxu1 }
 0x1c9   :  { %v384_v21 = vmax.f32 %v368_v15, 0.0  ;;  %v316_v25 = vadd.f32 %v315_v23, %v249_v5  ;;  %v317_v26 = vpop.f32.mrb[7].mxu1  ;;  %v379_v29 = vmax.f32 %v312_v18, 0.0 }
 0x1ca   :  { %v396_v24 = vpack.c.bf16 %v390_v17, %v387_v2  ;;  %v318_v28 = vadd.f32 %v317_v26, %v249_v5  ;;  %v380_v31 = vmax.f32 %v314_v22, 0.0  ;;  %v489_v5 = vshrl.u32 %v488_v1, 7 }
 0x1cb   :  { %v393_v27 = vpack.c.bf16 %v384_v21, %v381_v20  ;;  %v382_v30 = vmax.f32 %v316_v25, 0.0 }
 0x1cc   :  { %v383_v32 = vmax.f32 %v318_v28, 0.0  ;;  %vm490_vm2 = vcmp.eq.s32.totalorder %v489_v5, 1 }
 0x1cd   :  { %583 = vmatpush3.bf16.msra.mxu1 %v393_v27  ;;  %v391_v33 = vpack.c.bf16 %v382_v30, %v379_v29 }
 0x1ce   :  { %584 = vmatprep.subr.bf16.mxu1 %v640_v3  ;;  %v392_v34 = vpack.c.bf16 %v383_v32, %v380_v31  ;;  %v321_v35 = vpop.f32.mrb[8].mxu1  ;;  %v642_v3 = vmov 1983009808  }
 0x1cf   :  { %v322_v36 = vadd.f32 %v321_v35, %v254_v6  ;;  %v323_v37 = vpop.f32.mrb[9].mxu1  ;;  %v505_v4 = vunpack.c.l.s4 %v642_v3 }
 0x1d0   :  { %v324_v38 = vadd.f32 %v323_v37, %v254_v6  ;;  %v325_v39 = vpop.f32.mrb[10].mxu1  ;;  %407 = vmatprep.subr.bf16.mxu0 %v392_v34 }
 0x1d1   :  { %585 = vmatpush3.bf16.msra.mxu1 %v396_v24  ;;  %v326_v41 = vadd.f32 %v325_v39, %v259_v10  ;;  %v327_v42 = vpop.f32.mrb[11].mxu1  ;;  %408 = vmatpush1.bf16.msra.mxu0 %v391_v33  ;;  %v385_v44 = vmax.f32 %v322_v36, 0.0  ;;  %v506_v6 = vunpack.c.0.s8 %v505_v4 }
 0x1d2   :  { %v328_v43 = vadd.f32 %v327_v42, %v259_v10  ;;  %v386_v46 = vmax.f32 %v324_v38, 0.0 }
 0x1d3   :  { %v388_v45 = vmax.f32 %v326_v41, 0.0  ;;  %v509_v11 = vsub.s32 %v506_v6, %v489_v5 }
 0x1d4   :  { %587 = vmatmul.mubr.msk.bf16.vlgmr.msra.gmra.mrb[12].mxu1 %vm106_vm0, %v397_v40  ;;  %v389_v47 = vmax.f32 %v328_v43, 0.0 }
 0x1d5   :  { %v394_v48 = vpack.c.bf16 %v388_v45, %v385_v44 }
 0x1d6   :  { %v395_v49 = vpack.c.bf16 %v389_v47, %v386_v46 }
 0x1d8   :  { %409 = vmatprep.subr.bf16.mxu0 %v395_v49 }
 0x1d9   :  { %410 = vmatpush1.bf16.msra.mxu0 %v394_v48 }
 0x1dc   :  { %553 = vmatmul.mubr.msk.bf16.vlgmr.msra.gmra.mrb[12].mxu0 %vm106_vm0, %v397_v40 }
 0x2a7   :  { %v482_v50 = vpop.f32.mrb[12].mxu1 }
 0x2a8   :  { %v588_v51 = vpop.f32.mrb[13].mxu1  ;;  %v483_v55 = vadd.f32 %v482_v50, %v402_v54 }
 0x2a9   :  { %v485_v52 = vpop.f32.mrb[14].mxu1 }
 0x2aa   :  { %v589_v53 = vpop.f32.mrb[15].mxu1  ;;  %v495_v56 = vmul.f32 1.442695, %v483_v55 }
 0x2ac   :  { %609 = vpow2.f32 %v495_v56 }
 0x2af   :  { %v441_v57 = vpop.f32.mrb[12].mxu0 }
 0x2b0   :  { %v442_v58 = vadd.f32 %v441_v57, %v402_v54  ;;  %v443_v59 = vpop.f32.mrb[13].mxu0 }
 0x2b1   :  { %v444_v60 = vadd.f32 %v443_v59, %v402_v54  ;;  %v445_v61 = vpop.f32.mrb[14].mxu0 }
 0x2b2   :  { %v491_v62 = vmul.f32 1.442695, %v442_v58  ;;  %v446_v63 = vpop.f32.mrb[15].mxu0 }
 0x2b3   :  { %v493_v0 = vmul.f32 1.442695, %v444_v60 }
 0x2b4   :  { %611 = vpow2.f32 %v491_v62 }
 0x2b5   :  { %613 = vpow2.f32 %v493_v0 }
 0x2b6   :  { %v610_v7 = vpop.eup %609 }
 0x2b7   :  { %v499_v12 = vsel %vm490_vm2, %v610_v7, %v483_v55 }
 0x2b8   :  { %v517_v16 = vrot.slane %v499_v12, %v509_v11 }
 0x2be   :  { %v612_v8 = vpop.eup %611 }
 0x2bf   :  { %v614_v9 = vpop.eup %613  ;;  %v497_v10 = vsel %vm490_vm2, %v612_v8, %v442_v58 }
 0x2c0   :  { %v498_v13 = vsel %vm490_vm2, %v614_v9, %v444_v60 }
 0x2c1   :  { %v503_v14 = vcombine.low %v497_v10, %v498_v13 }
 0x2c3   :  { %v510_v15 = vrot.slane %v503_v14, %v509_v11 }
 0x2c5   :  { %v518_v2 = vcombine.low %v510_v15, %v517_v16 }
 0x2c7   :  { %520 = vst [vmem:[#allocation2] sm:$0x3f] %v518_v2 }
 0x2c8   :  { %626 = shalt.err (!%p623_p4)
}
 0x2c9   :  { %s627_s16 = scalar_lea.hbm %s780_s7, 96 }
 0x2ca   :  { %p628_p5 = scmp.ne.s32.totalorder %s780_s7, %s627_s16  ;;  %p631_p6 = scmp.lt.u32.totalorder %s627_s16, %s780_s7 }
 0x2cc   :  { %p633_p7 = pnand %p631_p6, %p628_p5 }
 0x2ce   :  { %636 = shalt.err (!%p633_p7)
}
 0x2cf   :  { %530 = dma.vmem_to_hbm [thread:$0]  %s528_s12, 96, %s780_s7, [#allocation3]  }
 0x2d0   :  { %637 = dma.done.wait [#allocation3], 96  }
 0x2d1   :  { %638 = vsyncadd [#allocation3], 4294967200 }
 0x2d2   :  { %534 = vsyncpa [#allocation3], 1 }

</bundles_post_ra>
